<compile_context>
chip_gen: v7x
topology: tpu7x:2x2x1
jax: 0.10.0
libtpu: 0.0.40
codegen_flags: <defaults>
</compile_context>

<pallas_src>
import jax
import jax.numpy as jnp
from jax import lax
from jax.experimental import pallas as pl
from jax.experimental.pallas import tpu as pltpu


TB_MAX = 1024  # max batch tile (lane dim of every activation); multiple of 128.


def _batch_tiling(batch, tb_max=TB_MAX):
    """Pick (tb, b_pad): tb a multiple of 128 dividing b_pad, tb <= tb_max, and
    >= 2 grid steps whenever the padded batch allows it (v7x megacore)."""
    b_pad = pl.cdiv(batch, 128) * 128
    if b_pad > tb_max:
        b_pad = pl.cdiv(batch, tb_max) * tb_max
        return tb_max, b_pad
    if b_pad >= 256 and b_pad % 256 == 0:
        return b_pad // 2, b_pad  # 2 steps -> both v7x TensorCores engage
    return b_pad, b_pad           # tiny batch: single step


def mlp_kernel(x_ref, w1_ref, b1_ref, w2_ref, b2_ref, w3_ref, b3_ref, o_ref):
    # x_ref : (TB, state_dim) f32  -- streamed, natural layout
    # w*    : (out_features, in_features) f32 (PyTorch layout, VMEM-resident)
    # b*    : (out_features, 1) f32
    # o_ref : (nb_actions, TB) f32 -- transposed => lane-dense store
    hp = lax.Precision.HIGHEST
    x = x_ref[...]

    # fc1 + relu: contract x's last dim with w1's last dim -> (32, TB).
    # The MXU handles the rhs-transposed form, so no explicit transpose of x.
    h1 = lax.dot_general(w1_ref[...], x, (((1,), (1,)), ((), ())),
                         precision=hp, preferred_element_type=jnp.float32)
    h1 = jnp.maximum(h1 + b1_ref[...], 0.0)

    # fc2 + relu -> (64, TB)
    h2 = jnp.dot(w2_ref[...], h1, precision=hp,
                 preferred_element_type=jnp.float32)
    h2 = jnp.maximum(h2 + b2_ref[...], 0.0)

    # fc4 (no activation) -> (nb_actions, TB), lane-dense store
    out = jnp.dot(w3_ref[...], h2, precision=hp,
                  preferred_element_type=jnp.float32)
    o_ref[...] = (out + b3_ref[...]).astype(o_ref.dtype)


def net_forward(x, params):
    """x: (B, state_dim) f32. Returns (B, nb_actions) f32."""
    w1, b1, w2, b2, w3, b3 = params
    B, state_dim = x.shape
    nb_actions = w3.shape[0]

    tb, b_pad = _batch_tiling(B)
    if b_pad != B:  # pad only when needed (zero-cost when already aligned)
        x = jnp.pad(x, ((0, b_pad - B), (0, 0)))

    resident = lambda a: pl.BlockSpec(a.shape, lambda i: (0, 0))  # stays in VMEM

    out_t = pl.pallas_call(
        mlp_kernel,
        out_shape=jax.ShapeDtypeStruct((nb_actions, b_pad), jnp.float32),
        grid=(b_pad // tb,),
        in_specs=[
            pl.BlockSpec((tb, state_dim), lambda i: (i, 0)),   # streamed x tile
            resident(w1), resident(b1),
            resident(w2), resident(b2),
            resident(w3), resident(b3),
        ],
        out_specs=pl.BlockSpec((nb_actions, tb), lambda i: (0, i)),
        compiler_params=pltpu.CompilerParams(
            dimension_semantics=("parallel",)),                # megacore on v7x
    )(x, w1, b1, w2, b2, w3, b3)

    # Padded batch columns compute garbage but are sliced off here; nothing in the
    # kernel reduces over the batch axis, so the padding never contaminates results.
    return out_t[:, :B].T


def init_params(key, state_dim, nb_actions):
    # nn.Linear-style init (uniform(-1/sqrt(fan_in), 1/sqrt(fan_in))), f32 throughout.
    # Weights kept in PyTorch's [out, in] layout; biases stored (out, 1) for the
    # transposed-activation broadcast.
    def linear(k, fan_in, fan_out):
        kw, kb = jax.random.split(k)
        bound = 1.0 / jnp.sqrt(jnp.float32(fan_in))
        w = jax.random.uniform(kw, (fan_out, fan_in), jnp.float32, -bound, bound)
        b = jax.random.uniform(kb, (fan_out, 1), jnp.float32, -bound, bound)
        return w, b

    k1, k2, k3 = jax.random.split(key, 3)
    w1, b1 = linear(k1, state_dim, 32)
    w2, b2 = linear(k2, 32, 64)
    w3, b3 = linear(k3, 64, nb_actions)
    return w1, b1, w2, b2, w3, b3


def reference_forward(x, params):
    # Pure-JAX f32 reference matching the PyTorch Net forward.
    w1, b1, w2, b2, w3, b3 = params
    hp = lax.Precision.HIGHEST
    h = jnp.maximum(jnp.dot(x, w1.T, precision=hp) + b1[:, 0], 0.0)
    h = jnp.maximum(jnp.dot(h, w2.T, precision=hp) + b2[:, 0], 0.0)
    return jnp.dot(h, w3.T, precision=hp) + b3[:, 0]


if __name__ == "__main__":
    state_dim = 8
    nb_actions = 4
    batch = 2

    key = jax.random.PRNGKey(0)
    kx, kp = jax.random.split(key)
    x = jax.random.normal(kx, (batch, state_dim), jnp.float32)
    params = init_params(kp, state_dim, nb_actions)

    fwd = jax.jit(net_forward)
    out = jax.block_until_ready(fwd(x, params))
    ref = reference_forward(x, params)

    assert out.shape == (batch, nb_actions)
    assert jnp.allclose(out, ref, atol=1e-3, rtol=1e-3)
    print("KERNEL_OK")
</pallas_src>

<mosaic_0001>
module attributes {stable_mosaic.version = 11 : i64} {
  func.func @mlp_kernel(%arg0: i32, %arg1: memref<128x8xf32, #tpu.memory_space<vmem>>, %arg2: memref<32x8xf32, #tpu.memory_space<vmem>>, %arg3: memref<32x1xf32, #tpu.memory_space<vmem>>, %arg4: memref<64x32xf32, #tpu.memory_space<vmem>>, %arg5: memref<64x1xf32, #tpu.memory_space<vmem>>, %arg6: memref<4x64xf32, #tpu.memory_space<vmem>>, %arg7: memref<4x1xf32, #tpu.memory_space<vmem>>, %arg8: memref<4x128xf32, #tpu.memory_space<vmem>>) attributes {dimension_semantics = [#tpu.dimension_semantics<parallel>], iteration_bounds = array<i64: 1>, scalar_prefetch = 0 : i64, scratch_operands = 0 : i64, tpu.core_type = #tpu.core_type<tc>, window_params = [{transform_indices = @transform_0, window_bounds = array<i64: 128, 8>}, {pipeline_mode = #tpu.pipeline_mode<synchronous>, transform_indices = @transform_1, window_bounds = array<i64: 32, 8>}, {pipeline_mode = #tpu.pipeline_mode<synchronous>, transform_indices = @transform_2, window_bounds = array<i64: 32, 1>}, {pipeline_mode = #tpu.pipeline_mode<synchronous>, transform_indices = @transform_3, window_bounds = array<i64: 64, 32>}, {pipeline_mode = #tpu.pipeline_mode<synchronous>, transform_indices = @transform_4, window_bounds = array<i64: 64, 1>}, {pipeline_mode = #tpu.pipeline_mode<synchronous>, transform_indices = @transform_5, window_bounds = array<i64: 4, 64>}, {pipeline_mode = #tpu.pipeline_mode<synchronous>, transform_indices = @transform_6, window_bounds = array<i64: 4, 1>}, {transform_indices = @transform_7, window_bounds = array<i64: 4, 128>}]} {
    %c0 = arith.constant 0 : index
    %c0_0 = arith.constant 0 : index
    %0 = vector.load %arg1[%c0, %c0_0] : memref<128x8xf32, #tpu.memory_space<vmem>>, vector<128x8xf32>
    %c0_1 = arith.constant 0 : index
    %c0_2 = arith.constant 0 : index
    %1 = vector.load %arg2[%c0_1, %c0_2] : memref<32x8xf32, #tpu.memory_space<vmem>>, vector<32x8xf32>
    %cst = arith.constant dense<0.000000e+00> : vector<32x128xf32>
    %2 = tpu.matmul %1, %0, %cst {dimension_numbers = #tpu.dot_dimension_numbers<[1], [1], [0], [0], [0, 0, 1, 0], [], []>, precision = #tpu.contract_precision<fp32>} : vector<32x8xf32>, vector<128x8xf32>, vector<32x128xf32> -> vector<32x128xf32>
    %c0_3 = arith.constant 0 : index
    %c0_4 = arith.constant 0 : index
    %3 = vector.load %arg3[%c0_3, %c0_4] : memref<32x1xf32, #tpu.memory_space<vmem>>, vector<32x1xf32>
    %4 = vector.broadcast %3 : vector<32x1xf32> to vector<32x128xf32>
    %5 = arith.addf %2, %4 : vector<32x128xf32>
    %cst_5 = arith.constant 0.000000e+00 : f32
    %6 = vector.broadcast %cst_5 : f32 to vector<32x128xf32>
    %7 = arith.maximumf %5, %6 : vector<32x128xf32>
    %c0_6 = arith.constant 0 : index
    %c0_7 = arith.constant 0 : index
    %8 = vector.load %arg4[%c0_6, %c0_7] : memref<64x32xf32, #tpu.memory_space<vmem>>, vector<64x32xf32>
    %cst_8 = arith.constant dense<0.000000e+00> : vector<64x128xf32>
    %9 = tpu.matmul %8, %7, %cst_8 {dimension_numbers = #tpu.dot_dimension_numbers<[1], [0], [0], [1], [0, 0, 1, 1], [], []>, precision = #tpu.contract_precision<fp32>} : vector<64x32xf32>, vector<32x128xf32>, vector<64x128xf32> -> vector<64x128xf32>
    %c0_9 = arith.constant 0 : index
    %c0_10 = arith.constant 0 : index
    %10 = vector.load %arg5[%c0_9, %c0_10] : memref<64x1xf32, #tpu.memory_space<vmem>>, vector<64x1xf32>
    %11 = vector.broadcast %10 : vector<64x1xf32> to vector<64x128xf32>
    %12 = arith.addf %9, %11 : vector<64x128xf32>
    %cst_11 = arith.constant 0.000000e+00 : f32
    %13 = vector.broadcast %cst_11 : f32 to vector<64x128xf32>
    %14 = arith.maximumf %12, %13 : vector<64x128xf32>
    %c0_12 = arith.constant 0 : index
    %c0_13 = arith.constant 0 : index
    %15 = vector.load %arg6[%c0_12, %c0_13] : memref<4x64xf32, #tpu.memory_space<vmem>>, vector<4x64xf32>
    %cst_14 = arith.constant dense<0.000000e+00> : vector<4x128xf32>
    %16 = tpu.matmul %15, %14, %cst_14 {dimension_numbers = #tpu.dot_dimension_numbers<[1], [0], [0], [1], [0, 0, 1, 1], [], []>, precision = #tpu.contract_precision<fp32>} : vector<4x64xf32>, vector<64x128xf32>, vector<4x128xf32> -> vector<4x128xf32>
    %c0_15 = arith.constant 0 : index
    %c0_16 = arith.constant 0 : index
    %17 = vector.load %arg7[%c0_15, %c0_16] : memref<4x1xf32, #tpu.memory_space<vmem>>, vector<4x1xf32>
    %18 = vector.broadcast %17 : vector<4x1xf32> to vector<4x128xf32>
    %19 = arith.addf %16, %18 : vector<4x128xf32>
    %c0_17 = arith.constant 0 : index
    %c0_18 = arith.constant 0 : index
    %20 = vector.load %arg8[%c0_17, %c0_18] : memref<4x128xf32, #tpu.memory_space<vmem>>, vector<4x128xf32>
    tpu.vector_store %arg8[%c0_17, %c0_18], %19 {strides = array<i32>} : memref<4x128xf32, #tpu.memory_space<vmem>>, vector<4x128xf32>,
    return
  }
  func.func @transform_0(%arg0: i32) -> (i32, i32) {
    %c0_i32 = arith.constant 0 : i32
    %c0_i32_0 = arith.constant 0 : i32
    return %arg0, %c0_i32 : i32, i32
  }
  func.func @transform_1(%arg0: i32) -> (i32, i32) {
    %c0_i32 = arith.constant 0 : i32
    %c0_i32_0 = arith.constant 0 : i32
    %c0_i32_1 = arith.constant 0 : i32
    return %c0_i32, %c0_i32_0 : i32, i32
  }
  func.func @transform_2(%arg0: i32) -> (i32, i32) {
    %c0_i32 = arith.constant 0 : i32
    %c0_i32_0 = arith.constant 0 : i32
    %c0_i32_1 = arith.constant 0 : i32
    return %c0_i32, %c0_i32_0 : i32, i32
  }
  func.func @transform_3(%arg0: i32) -> (i32, i32) {
    %c0_i32 = arith.constant 0 : i32
    %c0_i32_0 = arith.constant 0 : i32
    %c0_i32_1 = arith.constant 0 : i32
    return %c0_i32, %c0_i32_0 : i32, i32
  }
  func.func @transform_4(%arg0: i32) -> (i32, i32) {
    %c0_i32 = arith.constant 0 : i32
    %c0_i32_0 = arith.constant 0 : i32
    %c0_i32_1 = arith.constant 0 : i32
    return %c0_i32, %c0_i32_0 : i32, i32
  }
  func.func @transform_5(%arg0: i32) -> (i32, i32) {
    %c0_i32 = arith.constant 0 : i32
    %c0_i32_0 = arith.constant 0 : i32
    %c0_i32_1 = arith.constant 0 : i32
    return %c0_i32, %c0_i32_0 : i32, i32
  }
  func.func @transform_6(%arg0: i32) -> (i32, i32) {
    %c0_i32 = arith.constant 0 : i32
    %c0_i32_0 = arith.constant 0 : i32
    %c0_i32_1 = arith.constant 0 : i32
    return %c0_i32, %c0_i32_0 : i32, i32
  }
  func.func @transform_7(%arg0: i32) -> (i32, i32) {
    %c0_i32 = arith.constant 0 : i32
    %c0_i32_0 = arith.constant 0 : i32
    return %c0_i32, %arg0 : i32, i32
  }
}

</mosaic_0001>

<bundles_post_ra>
// kernel: net_forward.1
= control target key start
LH: loop header
LB: loop body
LE: loop exit
PB: predicated region body
PF: predicated region fallthrough
CT: control target
= control target key end

     0   :  { %vm70_vm0 = vcmask 64512   ;;  %vm961_vm1 = vcmask 261120   ;;  %vm3443_vm2 = vmmov 0   ;;  %vm1787_vm3 = vcmask 523264   ;;  %s4175_s0 = inlined_call_operand.vmem [shape: f32[128,8], index: 0, kind: input, shape index: {}]   ;;  %s4176_s1 = inlined_call_operand.vmem [shape: f32[32,8], index: 1, kind: input, shape index: {}]   ;;  %s4177_s2 = inlined_call_operand.vmem [shape: f32[32,1], index: 2, kind: input, shape index: {}]   ;;  %s4178_s4 = inlined_call_operand.vmem [shape: f32[64,1], index: 4, kind: input, shape index: {}]   ;;  %s4179_s6 = inlined_call_operand.vmem [shape: f32[4,1], index: 6, kind: input, shape index: {}]   ;;  %s4180_s3 = inlined_call_operand.vmem [shape: f32[64,32], index: 3, kind: input, shape index: {}]   ;;  %s4181_s5 = inlined_call_operand.vmem [shape: f32[4,64], index: 5, kind: input, shape index: {}]   ;;  %s4182_s7 = inlined_call_operand.vmem [shape: f32[4,128], index: 7, kind: output, shape index: {}]  }
   0x1   :  { %v26_v0 = vld [vmem:[%s4175_s0] sm:$0xff]  ;;  %v27_v1 = vld [vmem:[%s4175_s0 + $0x8] sm:$0xff]  ;;  %v28_v2 = vld [vmem:[%s4175_s0 + $0x10] sm:$0xff] }
   0x2   :  { %v84_v3 = vsel %vm70_vm0, %v26_v0, 0  ;;  %v87_v4 = vsel %vm70_vm0, %v27_v1, 0  ;;  %v29_v5 = vld [vmem:[%s4175_s0 + $0x18] sm:$0xff]  ;;  %v90_v6 = vsel %vm70_vm0, %v28_v2, 0  ;;  %v30_v7 = vld [vmem:[%s4175_s0 + $0x20] sm:$0xff]  ;;  %v31_v8 = vld [vmem:[%s4175_s0 + $0x28] sm:$0xff] }
   0x3   :  { %v132_v9 = vand.u32 4294901760, %v84_v3  ;;  %v135_v10 = vand.u32 4294901760, %v87_v4  ;;  %v93_v11 = vsel %vm70_vm0, %v29_v5, 0  ;;  %v138_v12 = vand.u32 4294901760, %v90_v6  ;;  %v32_v26 = vld [vmem:[%s4175_s0 + $0x30] sm:$0xff]  ;;  %v33_v27 = vld [vmem:[%s4175_s0 + $0x38] sm:$0xff] }
   0x4   :  { %v141_v13 = vand.u32 4294901760, %v93_v11  ;;  %v96_v14 = vsel %vm70_vm0, %v30_v7, 0  ;;  %v99_v15 = vsel %vm70_vm0, %v31_v8, 0  ;;  %v102_v30 = vsel %vm70_vm0, %v32_v26, 0  ;;  %v42_v32 = vld [vmem:[%s4176_s1] sm:$0xff]  ;;  %v35_v39 = vld [vmem:[%s4175_s0 + $0x48] sm:$0xff] }
   0x5   :  { %v3509_v16 = vpack.c.bf16 %v135_v10, %v132_v9  ;;  %v3511_v17 = vsub.f32 %v84_v3, %v132_v9  ;;  %v3513_v18 = vsub.f32 %v87_v4, %v135_v10  ;;  %v3515_v19 = vsub.f32 %v90_v6, %v138_v12  ;;  %v34_v38 = vld [vmem:[%s4175_s0 + $0x40] sm:$0xff]  ;;  %v36_v58 = vld [vmem:[%s4175_s0 + $0x50] sm:$0xff]  ;;  %v37_v59 = vld [vmem:[%s4175_s0 + $0x58] sm:$0xff] }
   0x6   :  { %v3517_v20 = vpack.c.bf16 %v141_v13, %v138_v12  ;;  %v3519_v21 = vsub.f32 %v93_v11, %v141_v13  ;;  %v144_v23 = vand.u32 4294901760, %v96_v14  ;;  %v147_v24 = vand.u32 4294901760, %v99_v15  ;;  %v38_v13 = vld [vmem:[%s4175_s0 + $0x60] sm:$0xff] }
   0x7   :  { %v3105_v22 = vpack.c.bf16 %v3513_v18, %v3511_v17  ;;  %3042 = vmatprep.subr.bf16.mxu1 %v3509_v16  ;;  %v105_v31 = vsel %vm70_vm0, %v33_v27, 0  ;;  %v150_v35 = vand.u32 4294901760, %v102_v30  ;;  %v72_v37 = vsel %vm70_vm0, %v42_v32, 0 }
   0x8   :  { %v3109_v25 = vpack.c.bf16 %v3519_v21, %v3515_v19  ;;  %3044 = vmatpush3.bf16.xpose.msra.mxu1 %v3509_v16  ;;  %v3534_v28 = vsub.f32 %v96_v14, %v144_v23  ;;  %v3536_v29 = vsub.f32 %v99_v15, %v147_v24  ;;  %v3543_v33 = vpack.c.bf16 %v147_v24, %v144_v23  ;;  %v39_v14 = vld [vmem:[%s4175_s0 + $0x68] sm:$0xff] }
   0x9   :  { %3106 = vmatprep.subr.bf16.mxu0 %v3105_v22  ;;  %3046 = vmatprep.subr.bf16.mxu1 %v3517_v20  ;;  %v153_v36 = vand.u32 4294901760, %v105_v31  ;;  %v3555_v40 = vand.u32 4294901760, %v72_v37  ;;  %v3558_v41 = vsub.f32 %v102_v30, %v150_v35  ;;  %v108_v43 = vsel %vm70_vm0, %v34_v38, 0 }
   0xa   :  { %3108 = vmatpush3.bf16.xpose.msra.mxu0 %v3105_v22  ;;  %v3113_v34 = vpack.c.bf16 %v3536_v29, %v3534_v28  ;;  %v111_v45 = vsel %vm70_vm0, %v35_v39, 0  ;;  %v255_v48 = vand.u32 4294901760, %v3511_v17  ;;  %v262_v49 = vand.u32 4294901760, %v3513_v18 }
   0xb   :  { %3110 = vmatprep.subr.bf16.mxu0 %v3109_v25  ;;  %v3560_v42 = vsub.f32 %v105_v31, %v153_v36  ;;  %v3564_v44 = vsub.f32 %v72_v37, %v3555_v40  ;;  %v3567_v46 = vpack.c.bf16 %v153_v36, %v150_v35  ;;  %v156_v50 = vand.u32 4294901760, %v108_v43  ;;  %v40_v35 = vld [vmem:[%s4175_s0 + $0x70] sm:$0xff]  ;;  %v41_v36 = vld [vmem:[%s4175_s0 + $0x78] sm:$0xff] }
   0xc   :  { %v269_v51 = vand.u32 4294901760, %v3515_v19  ;;  %v276_v52 = vand.u32 4294901760, %v3519_v21  ;;  %v159_v54 = vand.u32 4294901760, %v111_v45  ;;  %v3584_v56 = vpack.c.bf16 %v262_v49, %v255_v48 }
   0xd   :  { %2687 = vmatprep.mubr.f32.mxu0 %v3564_v44  ;;  %v214_v47 = vand.u32 4294901760, %v3564_v44  ;;  %v3117_v53 = vpack.c.bf16 %v3560_v42, %v3558_v41  ;;  %v283_v61 = vand.u32 4294901760, %v3534_v28  ;;  %v290_v62 = vand.u32 4294901760, %v3536_v29 }
   0xe   :  { %v3591_v57 = vpack.c.bf16 %v276_v52, %v269_v51  ;;  %v3602_v63 = vsub.f32 %v108_v43, %v156_v50  ;;  %v3604_v0 = vsub.f32 %v111_v45, %v159_v54  ;;  %v297_v1 = vand.u32 4294901760, %v3558_v41 }
   0xf   :  { %v215_v55 = vsub.f32 %v3564_v44, %v214_v47  ;;  %v304_v2 = vand.u32 4294901760, %v3560_v42  ;;  %v114_v3 = vsel %vm70_vm0, %v36_v58, 0  ;;  %v117_v4 = vsel %vm70_vm0, %v37_v59, 0  ;;  %v43_v58 = vld [vmem:[%s4176_s1 + $0x8] sm:$0xff]  ;;  %v44_v59 = vld [vmem:[%s4176_s1 + $0x10] sm:$0xff] }
  0x10   :  { %3048 = vmatpush3.bf16.xpose.msra.mxu1 %v3517_v20  ;;  %v3614_v5 = vpack.c.bf16 %v290_v62, %v283_v61  ;;  %v3616_v6 = vpack.c.bf16 %v159_v54, %v156_v50  ;;  %v3121_v8 = vpack.c.bf16 %v3604_v0, %v3602_v63  ;;  %v162_v9 = vand.u32 4294901760, %v114_v3 }
  0x11   :  { %3050 = vmatprep.subr.bf16.mxu1 %v3543_v33  ;;  %v216_v60 = vand.u32 4294901760, %v215_v55  ;;  %v3622_v7 = vpack.c.bf16 %v304_v2, %v297_v1  ;;  %v165_v10 = vand.u32 4294901760, %v117_v4  ;;  %v311_v11 = vand.u32 4294901760, %v3602_v63 }
  0x12   :  { %3112 = vmatpush3.bf16.xpose.msra.mxu0 %v3109_v25  ;;  %v318_v12 = vand.u32 4294901760, %v3604_v0  ;;  %v3642_v22 = vsub.f32 %v114_v3, %v162_v9  ;;  %v120_v24 = vsel %vm70_vm0, %v38_v13, 0  ;;  %v123_v25 = vsel %vm70_vm0, %v39_v14, 0  ;;  %v45_v14 = vld [vmem:[%s4176_s1 + $0x18] sm:$0xff] }
  0x13   :  { %3114 = vmatprep.subr.bf16.mxu0 %v3113_v34  ;;  %2611 = vmatprep.mubr.f32.mxu1 %v216_v60  ;;  %v3644_v23 = vsub.f32 %v117_v4, %v165_v10  ;;  %v3648_v26 = vpack.c.bf16 %v165_v10, %v162_v9  ;;  %v168_v30 = vand.u32 4294901760, %v120_v24  ;;  %v171_v31 = vand.u32 4294901760, %v123_v25 }
  0x14   :  { %v3640_v15 = vpack.c.bf16 %v318_v12, %v311_v11  ;;  %v325_v32 = vand.u32 4294901760, %v3642_v22  ;;  %v126_v43 = vsel %vm70_vm0, %v40_v35, 0  ;;  %v129_v45 = vsel %vm70_vm0, %v41_v36, 0 }
  0x15   :  { %v3125_v27 = vpack.c.bf16 %v3644_v23, %v3642_v22  ;;  %v3668_v38 = vsub.f32 %v120_v24, %v168_v30  ;;  %v3670_v39 = vsub.f32 %v123_v25, %v171_v31  ;;  %v3674_v50 = vpack.c.bf16 %v171_v31, %v168_v30 }
  0x16   :  { %v174_v54 = vand.u32 4294901760, %v126_v43  ;;  %v177_v55 = vand.u32 4294901760, %v129_v45  ;;  %v75_v4 = vsel %vm70_vm0, %v43_v58, 0  ;;  %v78_v13 = vsel %vm70_vm0, %v44_v59, 0 }
  0x17   :  { %v339_v60 = vand.u32 4294901760, %v3668_v38  ;;  %v346_v3 = vand.u32 4294901760, %v3670_v39  ;;  %v3705_v25 = vand.u32 4294901760, %v75_v4  ;;  %v263_v30 = vsub.f32 %v3513_v18, %v262_v49 }
  0x18   :  { %3052 = vmatpush3.bf16.xpose.msra.mxu1 %v3543_v33  ;;  %v3695_v9 = vsub.f32 %v126_v43, %v174_v54  ;;  %v3697_v10 = vsub.f32 %v129_v45, %v177_v55  ;;  %v3703_v24 = vpack.c.bf16 %v177_v55, %v174_v54  ;;  %v3713_v31 = vand.u32 4294901760, %v78_v13 }
  0x19   :  { %3054 = vmatprep.subr.bf16.mxu1 %v3567_v46  ;;  %v81_v35 = vsel %vm70_vm0, %v45_v14, 0  ;;  %v3722_v54 = vsub.f32 %v75_v4, %v3705_v25 }
  0x1a   :  { %3116 = vmatpush3.bf16.xpose.msra.mxu0 %v3113_v34  ;;  %v332_v34 = vand.u32 4294901760, %v3644_v23  ;;  %v3133_v36 = vpack.c.bf16 %v3697_v10, %v3695_v9  ;;  %v353_v43 = vand.u32 4294901760, %v3695_v9  ;;  %v360_v45 = vand.u32 4294901760, %v3697_v10 }
  0x1b   :  { %3118 = vmatprep.subr.bf16.mxu0 %v3117_v53  ;;  %v3728_v49 = vsub.f32 %v78_v13, %v3713_v31  ;;  %v4183_v58 = vand.u32 4294901760, %v3722_v54  ;;  %v277_v13 = vsub.f32 %v3519_v21, %v276_v52 }
  0x1c   :  { %v3666_v37 = vpack.c.bf16 %v332_v34, %v325_v32  ;;  %v3734_v55 = vpack.c.bf16 %v360_v45, %v353_v43 }
  0x1d   :  { %v4184_v59 = vand.u32 4294901760, %v3728_v49 }
  0x20   :  { %3056 = vmatpush3.bf16.xpose.msra.mxu1 %v3567_v46 }
  0x21   :  { %3058 = vmatprep.subr.bf16.mxu1 %v3616_v6 }
  0x22   :  { %3120 = vmatpush3.bf16.xpose.msra.mxu0 %v3117_v53  ;;  %v3129_v53 = vpack.c.bf16 %v3670_v39, %v3668_v38 }
  0x23   :  { %3122 = vmatprep.subr.bf16.mxu0 %v3121_v8 }
  0x28   :  { %3060 = vmatpush3.bf16.xpose.msra.mxu1 %v3616_v6 }
  0x29   :  { %3062 = vmatprep.subr.bf16.mxu1 %v3648_v26 }
  0x2a   :  { %3124 = vmatpush3.bf16.xpose.msra.mxu0 %v3121_v8  ;;  %v3693_v8 = vpack.c.bf16 %v346_v3, %v339_v60 }
  0x2b   :  { %3126 = vmatprep.subr.bf16.mxu0 %v3125_v27 }
  0x30   :  { %3064 = vmatpush3.bf16.xpose.msra.mxu1 %v3648_v26 }
  0x31   :  { %3066 = vmatprep.subr.bf16.mxu1 %v3674_v50 }
  0x32   :  { %3128 = vmatpush3.bf16.xpose.msra.mxu0 %v3125_v27  ;;  %v256_v27 = vsub.f32 %v3511_v17, %v255_v48  ;;  %v3725_v17 = vand.u32 4294901760, %v81_v35  ;;  %v264_v48 = vand.u32 4294901760, %v263_v30 }
  0x33   :  { %3130 = vmatprep.subr.bf16.mxu0 %v3129_v53 }
  0x34   :  { %v257_v18 = vand.u32 4294901760, %v256_v27  ;;  %v3739_v4 = vsub.f32 %v81_v35, %v3725_v17  ;;  %v225_v27 = vsub.f32 %v3722_v54, %v4183_v58  ;;  %v235_v35 = vsub.f32 %v3728_v49, %v4184_v59 }
  0x35   :  { %v284_v58 = vsub.f32 %v3534_v28, %v283_v61  ;;  %v291_v59 = vsub.f32 %v3536_v29, %v290_v62  ;;  %v298_v29 = vsub.f32 %v3558_v41, %v297_v1  ;;  %v305_v61 = vsub.f32 %v3560_v42, %v304_v2 }
  0x36   :  { %v3073_v14 = vpack.c.bf16 %v264_v48, %v257_v18  ;;  %v244_v30 = vand.u32 4294901760, %v3739_v4  ;;  %v278_v48 = vand.u32 4294901760, %v277_v13  ;;  %v312_v41 = vsub.f32 %v3602_v63, %v311_v11 }
  0x37   :  { %v292_v13 = vand.u32 4294901760, %v291_v59  ;;  %v299_v62 = vand.u32 4294901760, %v298_v29  ;;  %v319_v42 = vsub.f32 %v3604_v0, %v318_v12  ;;  %v326_v2 = vsub.f32 %v3642_v22, %v325_v32  ;;  %v912_v29 = vld [vmem:[%s4180_s3 + $0x38] sm:$0xff] }
  0x38   :  { %3068 = vmatpush3.bf16.xpose.msra.mxu1 %v3674_v50  ;;  %v245_v21 = vsub.f32 %v3739_v4, %v244_v30  ;;  %v313_v44 = vand.u32 4294901760, %v312_v41  ;;  %v333_v63 = vsub.f32 %v3644_v23, %v332_v34  ;;  %v347_v22 = vsub.f32 %v3670_v39, %v346_v3 }
  0x39   :  { %3070 = vmatprep.subr.bf16.mxu1 %v3703_v24  ;;  %v327_v0 = vand.u32 4294901760, %v326_v2 }
  0x3a   :  { %3132 = vmatpush3.bf16.xpose.msra.mxu0 %v3129_v53  ;;  %v270_v53 = vsub.f32 %v3515_v19, %v269_v51  ;;  %v226_v19 = vand.u32 4294901760, %v225_v27  ;;  %v236_v51 = vand.u32 4294901760, %v235_v35  ;;  %v334_v11 = vand.u32 4294901760, %v333_v63  ;;  %v915_v35 = vld [vmem:[%s4178_s4 + $0x10] sm:$0xff] }
  0x3b   :  { %3134 = vmatprep.subr.bf16.mxu0 %v3133_v36  ;;  %v348_v32 = vand.u32 4294901760, %v347_v22  ;;  %v354_v27 = vsub.f32 %v3695_v9, %v353_v43  ;;  %v4185_v9 = vand.u32 4294901760, %v3722_v54  ;;  %v3441_v43 = vmov 0  }
  0x3c   :  { %v271_v18 = vand.u32 4294901760, %v270_v53  ;;  %v246_v53 = vand.u32 4294901760, %v245_v21  ;;  %v3093_v12 = vpack.c.bf16 %v334_v11, %v327_v0  ;;  %3439 = vset.pattern.permute.xlu0 %v3441_v43  ;;  %3440 = vset.pattern.permute.xlu1 %v3441_v43  ;;  %v1781_v21 = vld [vmem:[%s4179_s6] sm:$0xf] }
  0x3d   :  { %v355_v39 = vand.u32 4294901760, %v354_v27 }
  0x3e   :  { %v3077_v52 = vpack.c.bf16 %v278_v48, %v271_v18  ;;  %v917_v18 = vld [vmem:[%s4178_s4 + $0x20] sm:$0xff]  ;;  %v918_v48 = vld [vmem:[%s4178_s4 + $0x28] sm:$0xff] }
  0x40   :  { %3072 = vmatpush3.bf16.xpose.msra.mxu1 %v3703_v24 }
  0x41   :  { %3074 = vmatprep.subr.bf16.mxu1 %v3073_v14 }
  0x42   :  { %3136 = vmatpush3.bf16.xpose.msra.mxu0 %v3133_v36  ;;  %v285_v36 = vand.u32 4294901760, %v284_v58  ;;  %v306_v58 = vand.u32 4294901760, %v305_v61  ;;  %v3946_v61 = vsel %vm961_vm1, %v912_v29, 0 }
  0x43   :  { %3138 = vmatprep.subr.bf16.mxu0 %v3509_v16 }
  0x44   :  { %v3081_v28 = vpack.c.bf16 %v292_v13, %v285_v36  ;;  %v3085_v59 = vpack.c.bf16 %v306_v58, %v299_v62  ;;  %v911_v13 = vld [vmem:[%s4180_s3 + $0x30] sm:$0xff] }
  0x47   :  { %2612 = vmatmul.mubr.f32.vlgmr.msra.gmra.mrb[0].mxu1 %v226_v19  ;;  %v919_v19 = vld [vmem:[%s4178_s4 + $0x30] sm:$0xff] }
  0x48   :  { %3076 = vmatpush3.bf16.xpose.msra.mxu1 %v3073_v14  ;;  %2614 = vmatprep.mubr.f32.mxu1 %v236_v51  ;;  %v340_v14 = vsub.f32 %v3668_v38, %v339_v60  ;;  %v361_v38 = vsub.f32 %v3697_v10, %v360_v45  ;;  %v4186_v10 = vand.u32 4294901760, %v3728_v49  ;;  %v46_v45 = vld [vmem:[%s4177_s2] sm:$0xff] }
  0x49   :  { %2688 = vmatmul.mubr.f32.vlgmr.msra.gmra.mrb[0].mxu0 %v3722_v54  ;;  %3078 = vmatprep.subr.bf16.mxu1 %v3077_v52  ;;  %v47_v54 = vld [vmem:[%s4177_s2 + $0x8] sm:$0xff] }
  0x4a   :  { %3140 = vmatpush3.bf16.xpose.msra.mxu0 %v3509_v16  ;;  %2690 = vmatprep.mubr.f32.mxu0 %v3728_v49  ;;  %v341_v23 = vand.u32 4294901760, %v340_v14  ;;  %v362_v60 = vand.u32 4294901760, %v361_v38  ;;  %v49_v49 = vld [vmem:[%s4177_s2 + $0x18] sm:$0xff] }
  0x4b   :  { %3142 = vmatprep.subr.bf16.mxu0 %v3517_v20  ;;  %2615 = vmatmul.mubr.f32.gmra.mrb[2].mxu1 %v246_v53 }
  0x4c   :  { %2649 = vmatprep.mubr.f32.mxu1 %v3555_v40  ;;  %v3097_v34 = vpack.c.bf16 %v348_v32, %v341_v23  ;;  %v3101_v3 = vpack.c.bf16 %v362_v60, %v355_v39  ;;  %52 = vperm.xlu0 %3439, %v46_v45  }
  0x4d   :  { %2691 = vmatmul.mubr.f32.gmra.mrb[2].mxu0 %v3739_v4  ;;  %v913_v4 = vld [vmem:[%s4178_s4] sm:$0xff] }
  0x4e   :  { %2725 = vmatprep.mubr.f32.mxu0 %v214_v47  ;;  %v320_v47 = vand.u32 4294901760, %v319_v42 }
  0x50   :  { %3080 = vmatpush3.bf16.xpose.msra.mxu1 %v3077_v52  ;;  %v3089_v1 = vpack.c.bf16 %v320_v47, %v313_v44  ;;  %57 = vperm.xlu0 %3439, %v47_v54   ;;  %v910_v52 = vld [vmem:[%s4180_s3 + $0x28] sm:$0xff] }
  0x51   :  { %3082 = vmatprep.subr.bf16.mxu1 %v3081_v28  ;;  %v978_v36 = vsel %vm961_vm1, %v910_v52, 0 }
  0x52   :  { %3144 = vmatpush3.bf16.xpose.msra.mxu0 %v3517_v20  ;;  %v3970_v54 = vand.u32 4294901760, %v978_v36 }
  0x53   :  { %3146 = vmatprep.subr.bf16.mxu0 %v3543_v33 }
  0x54   :  { %923 = vperm.xlu0 %3439, %v913_v4  }
  0x58   :  { %3084 = vmatpush3.bf16.xpose.msra.mxu1 %v3081_v28  ;;  %933 = vperm.xlu0 %3439, %v915_v35   ;;  %v981_v28 = vsel %vm961_vm1, %v911_v13, 0 }
  0x59   :  { %3086 = vmatprep.subr.bf16.mxu1 %v3085_v59 }
  0x5a   :  { %3148 = vmatpush3.bf16.xpose.msra.mxu0 %v3543_v33 }
  0x5b   :  { %3150 = vmatprep.subr.bf16.mxu0 %v3567_v46 }
  0x5c   :  { %943 = vperm.xlu0 %3439, %v917_v18  }
  0x60   :  { %3088 = vmatpush3.bf16.xpose.msra.mxu1 %v3085_v59  ;;  %953 = vperm.xlu0 %3439, %v919_v19  }
  0x61   :  { %3090 = vmatprep.subr.bf16.mxu1 %v3089_v1 }
  0x62   :  { %3152 = vmatpush3.bf16.xpose.msra.mxu0 %v3567_v46 }
  0x63   :  { %3154 = vmatprep.subr.bf16.mxu0 %v3616_v6 }
  0x64   :  { %1784 = vperm.xlu0 %3439, %v1781_v21  }
  0x68   :  { %3092 = vmatpush3.bf16.xpose.msra.mxu1 %v3089_v1 }
  0x69   :  { %3094 = vmatprep.subr.bf16.mxu1 %v3093_v12 }
  0x6a   :  { %3156 = vmatpush3.bf16.xpose.msra.mxu0 %v3616_v6 }
  0x6b   :  { %3158 = vmatprep.subr.bf16.mxu0 %v3648_v26 }
  0x70   :  { %3096 = vmatpush3.bf16.xpose.msra.mxu1 %v3093_v12 }
  0x71   :  { %3098 = vmatprep.subr.bf16.mxu1 %v3097_v34 }
  0x72   :  { %3160 = vmatpush3.bf16.xpose.msra.mxu0 %v3648_v26 }
  0x73   :  { %3162 = vmatprep.subr.bf16.mxu0 %v3674_v50 }
  0x78   :  { %3100 = vmatpush3.bf16.xpose.msra.mxu1 %v3097_v34 }
  0x79   :  { %3102 = vmatprep.subr.bf16.mxu1 %v3101_v3 }
  0x7a   :  { %3164 = vmatpush3.bf16.xpose.msra.mxu0 %v3674_v50 }
  0x7b   :  { %3166 = vmatprep.subr.bf16.mxu0 %v3703_v24 }
  0x80   :  { %3104 = vmatpush3.bf16.xpose.msra.mxu1 %v3101_v3 }
  0x82   :  { %3168 = vmatpush3.bf16.xpose.msra.mxu0 %v3703_v24 }
  0x83   :  { %3170 = vmatprep.subr.bf16.mxu0 %v3584_v56 }
  0x87   :  { %2650 = vmatmul.mubr.f32.vlgmr.msra.gmra.mrb[0].mxu1 %v3705_v25 }
  0x88   :  { %2652 = vmatprep.mubr.f32.mxu1 %v3713_v31 }
  0x89   :  { %2726 = vmatmul.mubr.f32.vlgmr.msra.gmra.mrb[0].mxu0 %v4185_v9 }
  0x8a   :  { %3172 = vmatpush3.bf16.xpose.msra.mxu0 %v3584_v56  ;;  %2728 = vmatprep.mubr.f32.mxu0 %v4186_v10  ;;  %v48_v56 = vld [vmem:[%s4177_s2 + $0x10] sm:$0xff] }
  0x8b   :  { %3174 = vmatprep.subr.bf16.mxu0 %v3591_v57  ;;  %2653 = vmatmul.mubr.f32.gmra.mrb[2].mxu1 %v3725_v17 }
  0x8c   :  { %62 = vperm.xlu1 %3440, %v48_v56  }
  0x8d   :  { %2729 = vmatmul.mubr.f32.gmra.mrb[2].mxu0 %v244_v30  ;;  %v914_v30 = vld [vmem:[%s4178_s4 + $0x8] sm:$0xff] }
  0x8e   :  { %2763 = vmatprep.mubr.f32.mxu0 %v3555_v40 }
  0x90   :  { %67 = vperm.xlu1 %3440, %v49_v49  }
  0x92   :  { %3176 = vmatpush3.bf16.xpose.msra.mxu0 %v3591_v57  ;;  %v916_v57 = vld [vmem:[%s4178_s4 + $0x18] sm:$0xff] }
  0x93   :  { %3178 = vmatprep.subr.bf16.mxu0 %v3614_v5 }
  0x94   :  { %928 = vperm.xlu1 %3440, %v914_v30  }
  0x98   :  { %938 = vperm.xlu1 %3440, %v916_v57  }
  0x9a   :  { %3180 = vmatpush3.bf16.xpose.msra.mxu0 %v3614_v5  ;;  %v920_v5 = vld [vmem:[%s4178_s4 + $0x38] sm:$0xff] }
  0x9b   :  { %3182 = vmatprep.subr.bf16.mxu0 %v3622_v7 }
  0x9c   :  { %948 = vperm.xlu1 %3440, %v918_v48   ;;  %v3975_v48 = vand.u32 4294901760, %v981_v28 }
  0xa0   :  { %958 = vperm.xlu1 %3440, %v920_v5  }
  0xa2   :  { %3184 = vmatpush3.bf16.xpose.msra.mxu0 %v3622_v7  ;;  %v906_v7 = vld [vmem:[%s4180_s3 + $0x8] sm:$0xff] }
  0xa3   :  { %3186 = vmatprep.subr.bf16.mxu0 %v3640_v15 }
  0xaa   :  { %3188 = vmatpush3.bf16.xpose.msra.mxu0 %v3640_v15 }
  0xab   :  { %3190 = vmatprep.subr.bf16.mxu0 %v3666_v37 }
  0xb2   :  { %3192 = vmatpush3.bf16.xpose.msra.mxu0 %v3666_v37 }
  0xb3   :  { %3194 = vmatprep.subr.bf16.mxu0 %v3693_v8 }
  0xba   :  { %3196 = vmatpush3.bf16.xpose.msra.mxu0 %v3693_v8 }
  0xbb   :  { %3198 = vmatprep.subr.bf16.mxu0 %v3734_v55 }
  0xc2   :  { %3200 = vmatpush3.bf16.xpose.msra.mxu0 %v3734_v55  ;;  %v909_v55 = vld [vmem:[%s4180_s3 + $0x20] sm:$0xff] }
  0xc3   :  { %3202 = vmatprep.subr.bf16.mxu0 %v3509_v16  ;;  %v975_v51 = vsel %vm961_vm1, %v909_v55, 0 }
  0xc4   :  { %v3964_v38 = vand.u32 4294901760, %v975_v51 }
  0xc6   :  { %v3973_v18 = vsub.f32 %v975_v51, %v3964_v38 }
  0xc9   :  { %2764 = vmatmul.mubr.f32.vlgmr.msra.gmra.mrb[0].mxu0 %v3705_v25 }
  0xca   :  { %3204 = vmatpush3.bf16.xpose.msra.mxu0 %v3509_v16  ;;  %2766 = vmatprep.mubr.f32.mxu0 %v3713_v31 }
  0xcb   :  { %3206 = vmatprep.subr.bf16.mxu0 %v3517_v20  ;;  %v53_v62 = vpop.permute.xlu0 %52 }
  0xcd   :  { %2767 = vmatmul.mubr.f32.gmra.mrb[2].mxu0 %v3725_v17 }
  0xce   :  { %2801 = vmatprep.mubr.f32.mxu0 %v3555_v40 }
  0xcf   :  { %v58_v41 = vpop.permute.xlu0 %57 }
  0xd2   :  { %3208 = vmatpush3.bf16.xpose.msra.mxu0 %v3517_v20 }
  0xd3   :  { %3210 = vmatprep.subr.bf16.mxu0 %v3543_v33 }
  0xda   :  { %3212 = vmatpush3.bf16.xpose.msra.mxu0 %v3543_v33 }
  0xdb   :  { %3214 = vmatprep.subr.bf16.mxu0 %v3567_v46 }
  0xe2   :  { %3216 = vmatpush3.bf16.xpose.msra.mxu0 %v3567_v46  ;;  %v905_v46 = vld [vmem:[%s4180_s3] sm:$0xff] }
  0xe3   :  { %3218 = vmatprep.subr.bf16.mxu0 %v3616_v6 }
  0xea   :  { %3220 = vmatpush3.bf16.xpose.msra.mxu0 %v3616_v6  ;;  %v963_v6 = vsel %vm961_vm1, %v905_v46, 0  ;;  %v3984_v46 = vsub.f32 %v978_v36, %v3970_v54 }
  0xeb   :  { %3222 = vmatprep.subr.bf16.mxu0 %v3648_v26  ;;  %v3911_v15 = vand.u32 4294901760, %v963_v6 }
  0xed   :  { %v3915_v37 = vsub.f32 %v963_v6, %v3911_v15  ;;  %2835 = vmatprep.mubr.f32.mxu1 %v3911_v15 }
  0xf2   :  { %3224 = vmatpush3.bf16.xpose.msra.mxu0 %v3648_v26  ;;  %v966_v26 = vsel %vm961_vm1, %v906_v7, 0 }
  0xf3   :  { %3226 = vmatprep.subr.bf16.mxu0 %v3674_v50  ;;  %v3948_v58 = vand.u32 4294901760, %v966_v26 }
  0xf5   :  { %v3951_v59 = vsub.f32 %v966_v26, %v3948_v58 }
  0xf7   :  { %v1067_v47 = vand.u32 4294901760, %v3951_v59 }
  0xf9   :  { %v1068_v32 = vsub.f32 %v3951_v59, %v1067_v47 }
  0xfa   :  { %3228 = vmatpush3.bf16.xpose.msra.mxu0 %v3674_v50  ;;  %v907_v50 = vld [vmem:[%s4180_s3 + $0x10] sm:$0xff] }
  0xfb   :  { %3230 = vmatprep.subr.bf16.mxu0 %v3703_v24  ;;  %v969_v8 = vsel %vm961_vm1, %v907_v50, 0  ;;  %v1069_v30 = vand.u32 4294901760, %v1068_v32  ;;  %v3988_v50 = vand.u32 4294901760, %v3946_v61 }
  0xfc   :  { %v3953_v44 = vand.u32 4294901760, %v969_v8 }
  0xfe   :  { %v3959_v14 = vsub.f32 %v969_v8, %v3953_v44 }
 0x100   :  { %v1077_v56 = vand.u32 4294901760, %v3959_v14 }
 0x102   :  { %3232 = vmatpush3.bf16.xpose.msra.mxu0 %v3703_v24  ;;  %v908_v24 = vld [vmem:[%s4180_s3 + $0x18] sm:$0xff] }
 0x109   :  { %2802 = vmatmul.mubr.f32.vlgmr.msra.gmra.mrb[0].mxu0 %v3705_v25  ;;  %v1057_v25 = vand.u32 4294901760, %v3915_v37 }
 0x10a   :  { %2804 = vmatprep.mubr.f32.mxu0 %v3713_v31  ;;  %v972_v31 = vsel %vm961_vm1, %v908_v24, 0 }
 0x10b   :  { %v63_v42 = vpop.permute.xlu1 %62  ;;  %v3956_v0 = vand.u32 4294901760, %v972_v31 }
 0x10d   :  { %2805 = vmatmul.mubr.f32.gmra.mrb[2].mxu0 %v3725_v17  ;;  %v1058_v17 = vsub.f32 %v3915_v37, %v1057_v25  ;;  %v3967_v9 = vsub.f32 %v972_v31, %v3956_v0  ;;  %v1097_v31 = vand.u32 4294901760, %v3973_v18 }
 0x10f   :  { %v1059_v53 = vand.u32 4294901760, %v1058_v17  ;;  %v68_v22 = vpop.permute.xlu1 %67  ;;  %v3993_v17 = vsub.f32 %v981_v28, %v3975_v48 }
 0x111   :  { %2815 = vmatprep.mubr.f32.mxu0 %v1059_v53 }
 0x15a   :  { %v2651_v16 = vpop.f32.mrb[0].mxu1 }
 0x15b   :  { %v399_v20 = vpop.f32.mrb[1].mxu1  ;;  %v3353_v1 = vadd.f32 %v2651_v16, %v58_v41  ;;  %v1087_v16 = vand.u32 4294901760, %v3967_v9 }
 0x15c   :  { %v3355_v2 = vadd.f32 %v399_v20, %v53_v62  ;;  %v1107_v62 = vand.u32 4294901760, %v3984_v46 }
 0x15d   :  { %v1088_v29 = vsub.f32 %v3967_v9, %v1087_v16 }
 0x15e   :  { %v2654_v33 = vpop.f32.mrb[2].mxu1 }
 0x15f   :  { %v411_v40 = vpop.f32.mrb[3].mxu1  ;;  %v3357_v34 = vadd.f32 %v2654_v33, %v68_v22 }
 0x160   :  { %v3359_v39 = vadd.f32 %v411_v40, %v63_v42  ;;  %v1078_v40 = vsub.f32 %v3959_v14, %v1077_v56 }
 0x1dc   :  { %v2803_v63 = vpop.f32.mrb[0].mxu0 }
 0x1dd   :  { %v3354_v11 = vadd.f32 %v3353_v1, %v2803_v63  ;;  %v879_v12 = vpop.f32.mrb[1].mxu0  ;;  %v4006_v1 = vsub.f32 %v3946_v61, %v3988_v50  ;;  %v1108_v61 = vsub.f32 %v3984_v46, %v1107_v62 }
 0x1de   :  { %v3356_v23 = vadd.f32 %v3355_v2, %v879_v12  ;;  %v1079_v2 = vand.u32 4294901760, %v1078_v40  ;;  %v1117_v12 = vand.u32 4294901760, %v3993_v17 }
 0x1df   :  { %v902_v27 = vmax.f32 %v3354_v11, 0.0  ;;  %v1098_v11 = vsub.f32 %v3973_v18, %v1097_v31 }
 0x1e0   :  { %v901_v60 = vmax.f32 %v3356_v23, 0.0  ;;  %v2806_v3 = vpop.f32.mrb[2].mxu0 }
 0x1e1   :  { %v990_v10 = vand.u32 4294901760, %v902_v27  ;;  %v3358_v43 = vadd.f32 %v3357_v34, %v2806_v3  ;;  %v891_v45 = vpop.f32.mrb[3].mxu0  ;;  %v1099_v3 = vand.u32 4294901760, %v1098_v11 }
 0x1e2   :  { %v987_v49 = vand.u32 4294901760, %v901_v60  ;;  %v3360_v4 = vadd.f32 %v3359_v39, %v891_v45  ;;  %v1109_v45 = vand.u32 4294901760, %v1108_v61 }
 0x1e3   :  { %v1144_v35 = vsub.f32 %v902_v27, %v990_v10  ;;  %v904_v57 = vmax.f32 %v3358_v43, 0.0  ;;  %v1089_v27 = vand.u32 4294901760, %v1088_v29 }
 0x1e4   :  { %v3977_v19 = vpack.c.bf16 %v990_v10, %v987_v49  ;;  %v1137_v5 = vsub.f32 %v901_v60, %v987_v49  ;;  %v903_v21 = vmax.f32 %v3360_v4, 0.0  ;;  %v1127_v60 = vand.u32 4294901760, %v4006_v1 }
 0x1e5   :  { %v1145_v20 = vand.u32 4294901760, %v1144_v35  ;;  %v996_v33 = vand.u32 4294901760, %v904_v57  ;;  %v1118_v10 = vsub.f32 %v3993_v17, %v1117_v12 }
 0x1e6   :  { %v1138_v6 = vand.u32 4294901760, %v1137_v5  ;;  %v993_v7 = vand.u32 4294901760, %v903_v21  ;;  %3234 = vmatprep.subr.bf16.mxu0 %v3977_v19  ;;  %v3249_v26 = vpack.c.bf16 %v1144_v35, %v1137_v5  ;;  %v1128_v49 = vsub.f32 %v4006_v1, %v1127_v60 }
 0x1e7   :  { %v1158_v8 = vsub.f32 %v904_v57, %v996_v33  ;;  %3236 = vmatpush3.bf16.msra.mxu0 %v3977_v19  ;;  %v1146_v24 = vsub.f32 %v1144_v35, %v1145_v20  ;;  %v1119_v4 = vand.u32 4294901760, %v1118_v10 }
 0x1e8   :  { %v3995_v55 = vpack.c.bf16 %v996_v33, %v993_v7  ;;  %v1151_v51 = vsub.f32 %v903_v21, %v993_v7  ;;  %v1139_v52 = vsub.f32 %v1137_v5, %v1138_v6  ;;  %v3997_v53 = vpack.c.bf16 %v1145_v20, %v1138_v6 }
 0x1e9   :  { %v1159_v36 = vand.u32 4294901760, %v1158_v8  ;;  %v1147_v13 = vand.u32 4294901760, %v1146_v24 }
 0x1ea   :  { %v1152_v41 = vand.u32 4294901760, %v1151_v51  ;;  %3238 = vmatprep.subr.bf16.mxu0 %v3995_v55  ;;  %v1140_v42 = vand.u32 4294901760, %v1139_v52  ;;  %v3253_v28 = vpack.c.bf16 %v1158_v8, %v1151_v51 }
 0x1eb   :  { %3240 = vmatpush3.bf16.msra.mxu0 %v3995_v55  ;;  %v1160_v63 = vsub.f32 %v1158_v8, %v1159_v36 }
 0x1ec   :  { %v3241_v22 = vpack.c.bf16 %v1147_v13, %v1140_v42  ;;  %v1153_v23 = vsub.f32 %v1151_v51, %v1152_v41  ;;  %v3269_v32 = vpack.c.bf16 %v1159_v36, %v1152_v41 }
 0x1ed   :  { %v1161_v34 = vand.u32 4294901760, %v1160_v63 }
 0x1ee   :  { %2816 = vmatmul.mubr.f32.vlgmr.msra.gmra.mrb[4].mxu0 %v1069_v30  ;;  %3242 = vmatprep.subr.bf16.mxu1 %v3241_v22  ;;  %v1154_v39 = vand.u32 4294901760, %v1153_v23  ;;  %v1129_v30 = vand.u32 4294901760, %v1128_v49 }
 0x1ef   :  { %3244 = vmatpush3.bf16.msra.mxu1 %v3241_v22  ;;  %2818 = vmatprep.mubr.f32.mxu0 %v1079_v2 }
 0x1f0   :  { %v3245_v43 = vpack.c.bf16 %v1161_v34, %v1154_v39 }
 0x1f2   :  { %2819 = vmatmul.mubr.f32.gmra.mrb[6].mxu0 %v1089_v27  ;;  %3246 = vmatprep.subr.bf16.mxu1 %v3245_v43 }
 0x1f3   :  { %3248 = vmatpush3.bf16.msra.mxu1 %v3245_v43  ;;  %2821 = vmatprep.mubr.f32.mxu0 %v1099_v3 }
 0x1f4   :  { %3250 = vmatprep.subr.bf16.mxu1 %v3249_v26 }
 0x1f6   :  { %2822 = vmatmul.mubr.f32.gmra.mrb[8].mxu0 %v1109_v45  ;;  %2836 = vmatmul.mubr.f32.vlgmr.msra.gmra.mrb[4].mxu1 %v3948_v58 }
 0x1f7   :  { %3252 = vmatpush3.bf16.msra.mxu1 %v3249_v26  ;;  %2824 = vmatprep.mubr.f32.mxu0 %v1119_v4 }
 0x1f8   :  { %3254 = vmatprep.subr.bf16.mxu1 %v3253_v28  ;;  %2838 = vmatprep.mubr.f32.mxu1 %v3953_v44 }
 0x1fa   :  { %2825 = vmatmul.mubr.f32.gmra.mrb[10].mxu0 %v1129_v30  ;;  %2839 = vmatmul.mubr.f32.gmra.mrb[6].mxu1 %v3956_v0 }
 0x1fb   :  { %3256 = vmatpush3.bf16.msra.mxu1 %v3253_v28  ;;  %2841 = vmatprep.mubr.f32.mxu1 %v3964_v38 }
 0x1fc   :  { %3258 = vmatprep.subr.bf16.mxu1 %v3977_v19 }
 0x1fe   :  { %2842 = vmatmul.mubr.f32.gmra.mrb[8].mxu1 %v3970_v54 }
 0x1ff   :  { %2844 = vmatprep.mubr.f32.mxu1 %v3975_v48 }
 0x202   :  { %2845 = vmatmul.mubr.f32.gmra.mrb[10].mxu1 %v3988_v50 }
 0x203   :  { %2855 = vmatprep.mubr.f32.mxu1 %v3915_v37  ;;  %v3442_v37 = vmov 0.0|0.0  }
 0x204   :  { %3281 = vmatprep.subr.bf16.mxu0 %v3442_v37 }
 0x206   :  { %2856 = vmatmul.mubr.f32.vlgmr.msra.gmra.mrb[4].mxu1 %v3951_v59 }
 0x207   :  { %3260 = vmatpush3.bf16.msra.mxu1 %v3977_v19  ;;  %2858 = vmatprep.mubr.f32.mxu1 %v3959_v14 }
 0x208   :  { %3262 = vmatprep.subr.bf16.mxu1 %v3995_v55 }
 0x20a   :  { %2859 = vmatmul.mubr.f32.gmra.mrb[6].mxu1 %v3967_v9  ;;  %v1780_v9 = vld [vmem:[%s4181_s5] sm:$0xf] }
 0x20b   :  { %3264 = vmatpush3.bf16.msra.mxu1 %v3995_v55  ;;  %2861 = vmatprep.mubr.f32.mxu1 %v3973_v18  ;;  %v1789_v35 = vsel %vm1787_vm3, %v1780_v9, 0 }
 0x20c   :  { %3266 = vmatprep.subr.bf16.mxu1 %v3997_v53  ;;  %v4081_v57 = vand.u32 4294901760, %v1789_v35 }
 0x20e   :  { %2862 = vmatmul.mubr.f32.gmra.mrb[8].mxu1 %v3984_v46  ;;  %v4084_v5 = vsub.f32 %v1789_v35, %v4081_v57 }
 0x20f   :  { %2864 = vmatprep.mubr.f32.mxu1 %v3993_v17 }
 0x210   :  { %v1866_v26 = vand.u32 4294901760, %v4084_v5 }
 0x212   :  { %2865 = vmatmul.mubr.f32.gmra.mrb[10].mxu1 %v4006_v1 }
 0x213   :  { %2875 = vmatprep.mubr.f32.mxu1 %v1057_v25 }
 0x216   :  { %2876 = vmatmul.mubr.f32.vlgmr.msra.gmra.mrb[4].mxu1 %v1067_v47 }
 0x217   :  { %3268 = vmatpush3.bf16.msra.mxu1 %v3997_v53  ;;  %2878 = vmatprep.mubr.f32.mxu1 %v1077_v56  ;;  %v929_v56 = vpop.permute.xlu1 %928 }
 0x218   :  { %3270 = vmatprep.subr.bf16.mxu1 %v3269_v32 }
 0x21a   :  { %2879 = vmatmul.mubr.f32.gmra.mrb[6].mxu1 %v1087_v16 }
 0x21b   :  { %3272 = vmatpush3.bf16.msra.mxu1 %v3269_v32  ;;  %2881 = vmatprep.mubr.f32.mxu1 %v1097_v31  ;;  %v939_v18 = vpop.permute.xlu1 %938 }
 0x21c   :  { %3274 = vmatprep.subr.bf16.mxu1 %v3977_v19 }
 0x21e   :  { %2882 = vmatmul.mubr.f32.gmra.mrb[8].mxu1 %v1107_v62  ;;  %v4092_v62 = vsub.f32 %v4084_v5, %v1866_v26 }
 0x21f   :  { %2884 = vmatprep.mubr.f32.mxu1 %v1117_v12  ;;  %v949_v40 = vpop.permute.xlu1 %948 }
 0x222   :  { %2885 = vmatmul.mubr.f32.gmra.mrb[10].mxu1 %v1127_v60 }
 0x223   :  { %2895 = vmatprep.mubr.f32.mxu1 %v3911_v15  ;;  %v959_v41 = vpop.permute.xlu1 %958 }
 0x226   :  { %2896 = vmatmul.mubr.f32.vlgmr.msra.gmra.mrb[4].mxu1 %v3948_v58 }
 0x227   :  { %3276 = vmatpush3.bf16.msra.mxu1 %v3977_v19  ;;  %2898 = vmatprep.mubr.f32.mxu1 %v3953_v44 }
 0x228   :  { %3278 = vmatprep.subr.bf16.mxu1 %v3995_v55 }
 0x22a   :  { %2899 = vmatmul.mubr.f32.gmra.mrb[6].mxu1 %v3956_v0 }
 0x22b   :  { %3280 = vmatpush3.bf16.msra.mxu1 %v3995_v55  ;;  %2901 = vmatprep.mubr.f32.mxu1 %v3964_v38 }
 0x22c   :  { %3293 = vmatprep.subr.bf16.mxu1 %v3442_v37 }
 0x22e   :  { %2902 = vmatmul.mubr.f32.gmra.mrb[8].mxu1 %v3970_v54 }
 0x22f   :  { %2904 = vmatprep.mubr.f32.mxu1 %v3975_v48 }
 0x232   :  { %2905 = vmatmul.mubr.f32.gmra.mrb[10].mxu1 %v3988_v50 }
 0x233   :  { %2915 = vmatprep.mubr.f32.mxu1 %v3911_v15  ;;  %v3444_v15 = vmov 0.0  }
 0x234   :  { %2943 = vmatprep.mubr.msk.f32.mxu0 %vm3443_vm2, %v3444_v15 }
 0x236   :  { %2916 = vmatmul.mubr.f32.vlgmr.msra.gmra.mrb[4].mxu1 %v3948_v58 }
 0x237   :  { %2918 = vmatprep.mubr.f32.mxu1 %v3953_v44 }
 0x23a   :  { %2919 = vmatmul.mubr.f32.gmra.mrb[6].mxu1 %v3956_v0 }
 0x23b   :  { %2921 = vmatprep.mubr.f32.mxu1 %v3964_v38 }
 0x23e   :  { %2922 = vmatmul.mubr.f32.gmra.mrb[8].mxu1 %v3970_v54  ;;  %v924_v54 = vpop.permute.xlu0 %923 }
 0x23f   :  { %2924 = vmatprep.mubr.f32.mxu1 %v3975_v48 }
 0x242   :  { %2925 = vmatmul.mubr.f32.gmra.mrb[10].mxu1 %v3988_v50  ;;  %v934_v48 = vpop.permute.xlu0 %933 }
 0x243   :  { %2962 = vmatprep.mubr.msk.f32.mxu1 %vm3443_vm2, %v3444_v15 }
 0x246   :  { %v944_v50 = vpop.permute.xlu0 %943 }
 0x24a   :  { %v954_v34 = vpop.permute.xlu0 %953 }
 0x2c1   :  { %v2817_v25 = vpop.f32.mrb[4].mxu0 }
 0x2c2   :  { %v1061_v58 = vpop.f32.mrb[5].mxu0  ;;  %v1072_v19 = vadd.f32 %v2817_v25, %v929_v56 }
 0x2c3   :  { %v1062_v21 = vadd.f32 %v1061_v58, %v924_v54 }
 0x2c5   :  { %v2820_v59 = vpop.f32.mrb[6].mxu0 }
 0x2c6   :  { %v1081_v44 = vpop.f32.mrb[7].mxu0  ;;  %v1092_v6 = vadd.f32 %v2820_v59, %v939_v18 }
 0x2c7   :  { %v1082_v8 = vadd.f32 %v1081_v44, %v934_v48 }
 0x2c9   :  { %v2823_v47 = vpop.f32.mrb[8].mxu0 }
 0x2ca   :  { %v1101_v0 = vpop.f32.mrb[9].mxu0  ;;  %v1112_v36 = vadd.f32 %v2823_v47, %v949_v40 }
 0x2cb   :  { %v1102_v42 = vadd.f32 %v1101_v0, %v944_v50 }
 0x2cd   :  { %v2826_v14 = vpop.f32.mrb[10].mxu0 }
 0x2ce   :  { %v1121_v38 = vpop.f32.mrb[11].mxu0  ;;  %v1132_v11 = vadd.f32 %v2826_v14, %v959_v41 }
 0x2cf   :  { %v1122_v3 = vadd.f32 %v1121_v38, %v954_v34 }
 0x309   :  { %v2917_v16 = vpop.f32.mrb[4].mxu1 }
 0x30a   :  { %v3362_v20 = vadd.f32 %v2917_v16, %v1072_v19  ;;  %v1726_v33 = vpop.f32.mrb[5].mxu1 }
 0x30b   :  { %v3364_v46 = vadd.f32 %v1726_v33, %v1062_v21 }
 0x30c   :  { %v1773_v7 = vmax.f32 %v3362_v20, 0.0 }
 0x30d   :  { %v1772_v24 = vmax.f32 %v3364_v46, 0.0  ;;  %v2920_v31 = vpop.f32.mrb[6].mxu1 }
 0x30e   :  { %v1795_v17 = vand.u32 4294901760, %v1773_v7  ;;  %v3366_v55 = vadd.f32 %v2920_v31, %v1092_v6  ;;  %v1738_v51 = vpop.f32.mrb[7].mxu1 }
 0x30f   :  { %v1792_v52 = vand.u32 4294901760, %v1772_v24  ;;  %v3368_v53 = vadd.f32 %v1738_v51, %v1082_v8  ;;  %v1868_v51 = vand.u32 4294901760, %v4092_v62 }
 0x310   :  { %v4087_v13 = vsub.f32 %v1773_v7, %v1795_v17  ;;  %v1775_v29 = vmax.f32 %v3366_v55, 0.0 }
 0x311   :  { %v4094_v28 = vpack.c.bf16 %v1795_v17, %v1792_v52  ;;  %v4096_v1 = vsub.f32 %v1772_v24, %v1792_v52  ;;  %v1774_v2 = vmax.f32 %v3368_v53, 0.0  ;;  %v2923_v63 = vpop.f32.mrb[8].mxu1 }
 0x312   :  { %v1884_v12 = vand.u32 4294901760, %v4087_v13  ;;  %v1801_v22 = vand.u32 4294901760, %v1775_v29  ;;  %v3370_v23 = vadd.f32 %v2923_v63, %v1112_v36  ;;  %v1750_v32 = vpop.f32.mrb[9].mxu1 }
 0x313   :  { %v1877_v27 = vand.u32 4294901760, %v4096_v1  ;;  %v1798_v39 = vand.u32 4294901760, %v1774_v2  ;;  %v3372_v61 = vadd.f32 %v1750_v32, %v1102_v42  ;;  %3283 = vmatpush3.bf16.msra.mxu0 %v4094_v28  ;;  %v3306_v60 = vpack.c.bf16 %v4087_v13, %v4096_v1 }
 0x314   :  { %v1885_v10 = vsub.f32 %v4087_v13, %v1884_v12  ;;  %v4104_v43 = vsub.f32 %v1775_v29, %v1801_v22  ;;  %v1777_v45 = vmax.f32 %v3370_v23, 0.0  ;;  %3284 = vmatprep.subr.bf16.mxu0 %v3442_v37  ;;  %v1785_v13 = vpop.permute.xlu0 %1784 }
 0x315   :  { %v1878_v49 = vsub.f32 %v4096_v1, %v1877_v27  ;;  %v4108_v4 = vpack.c.bf16 %v1801_v22, %v1798_v39  ;;  %v4110_v30 = vsub.f32 %v1774_v2, %v1798_v39  ;;  %v1776_v25 = vmax.f32 %v3372_v61, 0.0  ;;  %v2926_v58 = vpop.f32.mrb[10].mxu1 }
 0x316   :  { %v1886_v59 = vand.u32 4294901760, %v1885_v10  ;;  %v1898_v44 = vand.u32 4294901760, %v4104_v43  ;;  %v1807_v47 = vand.u32 4294901760, %v1777_v45  ;;  %v3374_v0 = vadd.f32 %v2926_v58, %v1132_v11  ;;  %v1762_v14 = vpop.f32.mrb[11].mxu1 }
 0x317   :  { %v1879_v38 = vand.u32 4294901760, %v1878_v49  ;;  %v1891_v9 = vand.u32 4294901760, %v4110_v30  ;;  %v1804_v56 = vand.u32 4294901760, %v1776_v25  ;;  %v3376_v54 = vadd.f32 %v1762_v14, %v1122_v3  ;;  %3286 = vmatpush3.bf16.msra.mxu0 %v4108_v4 }
 0x318   :  { %v1899_v35 = vsub.f32 %v4104_v43, %v1898_v44  ;;  %v1911_v18 = vsub.f32 %v1777_v45, %v1807_v47  ;;  %v1779_v48 = vmax.f32 %v3374_v0, 0.0  ;;  %3287 = vmatprep.subr.bf16.mxu0 %v3442_v37  ;;  %v3309_v19 = vpack.c.bf16 %v4104_v43, %v4110_v30 }
 0x319   :  { %v1892_v21 = vsub.f32 %v4110_v30, %v1891_v9  ;;  %v4120_v16 = vpack.c.bf16 %v1807_v47, %v1804_v56  ;;  %v1904_v20 = vsub.f32 %v1776_v25, %v1804_v56  ;;  %v1778_v33 = vmax.f32 %v3376_v54, 0.0 }
 0x31a   :  { %v1900_v40 = vand.u32 4294901760, %v1899_v35  ;;  %v1912_v46 = vand.u32 4294901760, %v1911_v18  ;;  %v1813_v6 = vand.u32 4294901760, %v1779_v48  ;;  %v3294_v7 = vpack.c.bf16 %v1886_v59, %v1879_v38 }
 0x31b   :  { %v1893_v50 = vand.u32 4294901760, %v1892_v21  ;;  %v1905_v8 = vand.u32 4294901760, %v1904_v20  ;;  %v1810_v24 = vand.u32 4294901760, %v1778_v33  ;;  %3289 = vmatpush3.bf16.msra.mxu0 %v4120_v16  ;;  %v3312_v31 = vpack.c.bf16 %v1911_v18, %v1904_v20 }
 0x31c   :  { %v1913_v17 = vsub.f32 %v1911_v18, %v1912_v46  ;;  %v1925_v55 = vsub.f32 %v1779_v48, %v1813_v6  ;;  %3295 = vmatpush3.bf16.msra.mxu1 %v3294_v7  ;;  %3290 = vmatprep.subr.bf16.mxu0 %v3442_v37  ;;  %v3330_v52 = vpack.c.bf16 %v1884_v12, %v1877_v27 }
 0x31d   :  { %v1906_v53 = vsub.f32 %v1904_v20, %v1905_v8  ;;  %v4125_v36 = vpack.c.bf16 %v1813_v6, %v1810_v24  ;;  %v1918_v29 = vsub.f32 %v1778_v33, %v1810_v24  ;;  %3296 = vmatprep.subr.bf16.mxu1 %v3442_v37  ;;  %v3297_v41 = vpack.c.bf16 %v1900_v40, %v1893_v50 }
 0x31e   :  { %v1914_v42 = vand.u32 4294901760, %v1913_v17  ;;  %v1926_v2 = vand.u32 4294901760, %v1925_v55  ;;  %v3333_v63 = vpack.c.bf16 %v1898_v44, %v1891_v9  ;;  %v3336_v11 = vpack.c.bf16 %v1912_v46, %v1905_v8 }
 0x31f   :  { %v1907_v22 = vand.u32 4294901760, %v1906_v53  ;;  %v1919_v23 = vand.u32 4294901760, %v1918_v29  ;;  %3292 = vmatpush3.bf16.msra.mxu0 %v4125_v36  ;;  %v3315_v32 = vpack.c.bf16 %v1925_v55, %v1918_v29 }
 0x320   :  { %v1927_v34 = vsub.f32 %v1925_v55, %v1926_v2  ;;  %3298 = vmatpush3.bf16.msra.mxu1 %v3297_v41 }
 0x321   :  { %v1920_v62 = vsub.f32 %v1918_v29, %v1919_v23  ;;  %3299 = vmatprep.subr.bf16.mxu1 %v3442_v37  ;;  %v3300_v12 = vpack.c.bf16 %v1914_v42, %v1907_v22  ;;  %v3339_v27 = vpack.c.bf16 %v1926_v2, %v1919_v23 }
 0x322   :  { %v1928_v39 = vand.u32 4294901760, %v1927_v34  ;;  %2944 = vmatmul.mubr.f32.vlgmr.msra.gmra.mrb[12].mxu0 %v1868_v51 }
 0x323   :  { %v1921_v61 = vand.u32 4294901760, %v1920_v62 }
 0x324   :  { %3301 = vmatpush3.bf16.msra.mxu1 %v3300_v12 }
 0x325   :  { %3302 = vmatprep.subr.bf16.mxu1 %v3442_v37  ;;  %v3303_v3 = vpack.c.bf16 %v1928_v39, %v1921_v61 }
 0x328   :  { %3304 = vmatpush3.bf16.msra.mxu1 %v3303_v3 }
 0x329   :  { %3305 = vmatprep.subr.bf16.mxu1 %v3442_v37 }
 0x32b   :  { %2963 = vmatmul.mubr.f32.vlgmr.msra.gmra.mrb[12].mxu1 %v4081_v57 }
 0x32c   :  { %3307 = vmatpush3.bf16.msra.mxu1 %v3306_v60  ;;  %2981 = vmatprep.mubr.msk.f32.mxu1 %vm3443_vm2, %v3444_v15 }
 0x32d   :  { %3308 = vmatprep.subr.bf16.mxu1 %v3442_v37 }
 0x330   :  { %3310 = vmatpush3.bf16.msra.mxu1 %v3309_v19 }
 0x331   :  { %3311 = vmatprep.subr.bf16.mxu1 %v3442_v37 }
 0x334   :  { %3313 = vmatpush3.bf16.msra.mxu1 %v3312_v31 }
 0x335   :  { %3314 = vmatprep.subr.bf16.mxu1 %v3442_v37 }
 0x338   :  { %3316 = vmatpush3.bf16.msra.mxu1 %v3315_v32 }
 0x339   :  { %3317 = vmatprep.subr.bf16.mxu1 %v3442_v37 }
 0x33b   :  { %2982 = vmatmul.mubr.f32.vlgmr.msra.gmra.mrb[12].mxu1 %v4084_v5 }
 0x33c   :  { %3319 = vmatpush3.bf16.msra.mxu1 %v4094_v28  ;;  %3000 = vmatprep.mubr.msk.f32.mxu1 %vm3443_vm2, %v3444_v15 }
 0x33d   :  { %3320 = vmatprep.subr.bf16.mxu1 %v3442_v37 }
 0x340   :  { %3322 = vmatpush3.bf16.msra.mxu1 %v4108_v4 }
 0x341   :  { %3323 = vmatprep.subr.bf16.mxu1 %v3442_v37 }
 0x344   :  { %3325 = vmatpush3.bf16.msra.mxu1 %v4120_v16 }
 0x345   :  { %3326 = vmatprep.subr.bf16.mxu1 %v3442_v37 }
 0x348   :  { %3328 = vmatpush3.bf16.msra.mxu1 %v4125_v36 }
 0x349   :  { %3329 = vmatprep.subr.bf16.mxu1 %v3442_v37 }
 0x34b   :  { %3001 = vmatmul.mubr.f32.vlgmr.msra.gmra.mrb[12].mxu1 %v1866_v26 }
 0x34c   :  { %3331 = vmatpush3.bf16.msra.mxu1 %v3330_v52  ;;  %3019 = vmatprep.mubr.msk.f32.mxu1 %vm3443_vm2, %v3444_v15 }
 0x34d   :  { %3332 = vmatprep.subr.bf16.mxu1 %v3442_v37 }
 0x350   :  { %3334 = vmatpush3.bf16.msra.mxu1 %v3333_v63 }
 0x351   :  { %3335 = vmatprep.subr.bf16.mxu1 %v3442_v37 }
 0x354   :  { %3337 = vmatpush3.bf16.msra.mxu1 %v3336_v11 }
 0x355   :  { %3338 = vmatprep.subr.bf16.mxu1 %v3442_v37 }
 0x358   :  { %3340 = vmatpush3.bf16.msra.mxu1 %v3339_v27 }
 0x359   :  { %3341 = vmatprep.subr.bf16.mxu1 %v3442_v37 }
 0x35b   :  { %3020 = vmatmul.mubr.f32.vlgmr.msra.gmra.mrb[12].mxu1 %v4081_v57 }
 0x35c   :  { %3343 = vmatpush3.bf16.msra.mxu1 %v4094_v28  ;;  %3038 = vmatprep.mubr.msk.f32.mxu1 %vm3443_vm2, %v3444_v15 }
 0x35d   :  { %3344 = vmatprep.subr.bf16.mxu1 %v3442_v37 }
 0x360   :  { %3346 = vmatpush3.bf16.msra.mxu1 %v4108_v4 }
 0x361   :  { %3347 = vmatprep.subr.bf16.mxu1 %v3442_v37 }
 0x364   :  { %3349 = vmatpush3.bf16.msra.mxu1 %v4120_v16 }
 0x365   :  { %3350 = vmatprep.subr.bf16.mxu1 %v3442_v37 }
 0x368   :  { %3352 = vmatpush3.bf16.msra.mxu1 %v4125_v36 }
 0x36b   :  { %3039 = vmatmul.mubr.f32.vlgmr.msra.gmra.mrb[12].mxu1 %v4081_v57 }
 0x3f5   :  { %v1870_v5 = vpop.f32.mrb[12].mxu0 }
 0x3f6   :  { %v2945_v26 = vpop.f32.mrb[13].mxu0  ;;  %v1871_v28 = vadd.f32 %v1870_v5, %v1785_v13 }
 0x43e   :  { %v2324_v1 = vpop.f32.mrb[12].mxu1 }
 0x43f   :  { %v3378_v15 = vadd.f32 %v2324_v1, %v1871_v28  ;;  %v3040_v60 = vpop.f32.mrb[13].mxu1 }
 0x441   :  { %2328 = vst [vmem:[%s4182_s7] sm:$0xf] %v3378_v15 }

</bundles_post_ra>
